<compile_context>
chip_gen: v7x
topology: tpu7x:2x2x1
jax: 0.10.0
libtpu: 0.0.40
codegen_flags: <defaults>
</compile_context>

<pallas_src>
import jax
import jax.numpy as jnp
from jax.experimental import pallas as pl
from jax.experimental.pallas import tpu as pltpu

LANE = 128


def _ceil_to(x, m):
    return -(-x // m) * m


# ---------------------------------------------------------------------------
# Fused kernel factory: all conv layers + ReLU + final Linear, TB batch
# elements per grid step.  Intermediate activations never touch HBM.
# ---------------------------------------------------------------------------
def _make_fused_kernel(cfg, k, c_pad, tb, l_last, mxu_dtype=jnp.bfloat16):
    """cfg: per conv layer (dilation, pad, l_in, l_out, c_in_real, mode)."""
    n_layers = len(cfg)

    def kernel(*args):
        x_ref = args[0]                          # (tb, L0, c_in_real)
        conv_refs = args[1:1 + 2 * n_layers]     # per layer: W (Kc, c_pad) bf16, b (1, c_pad) f32
        lin_w_ref = args[1 + 2 * n_layers]       # (c_pad, out_pad) bf16
        lin_b_ref = args[2 + 2 * n_layers]       # (1, out_pad) f32
        o_ref = args[3 + 2 * n_layers]           # (tb, l_last, out_pad)
        buf_ref = args[4 + 2 * n_layers]         # VMEM scratch (tb, halo_rows, c_pad) f32

        h = None                                 # (tb*l_prev_out, c_pad) f32 across layers
        for i, (d, p, l_in, l_out, c_in, mode) in enumerate(cfg):
            # ---- stage the layer input with zero row-halos ("same" padding).
            for b in range(tb):
                if i == 0:
                    src = x_ref[b].astype(jnp.float32)
                    if c_in < c_pad:             # lane-pad x in-kernel (no HBM pad)
                        src = jnp.concatenate(
                            [src, jnp.zeros((l_in, c_pad - c_in), jnp.float32)],
                            axis=-1)
                else:
                    src = h[b * l_in:(b + 1) * l_in, :]
                if p > 0:                        # halo-only zeroing
                    buf_ref[b, pl.ds(0, p), :] = jnp.zeros((p, c_pad), jnp.float32)
                    buf_ref[b, pl.ds(p + l_in, p), :] = jnp.zeros((p, c_pad), jnp.float32)
                buf_ref[b, pl.ds(p, l_in), :] = src

            # ---- im2col: build one (tb*l_out, Kc) activation matrix.
            blocks = []
            for b in range(tb):
                if mode == "tight":
                    # pack the k taps' real channels along lanes -> Kc = c_pad
                    parts = [buf_ref[b, pl.ds(t * d, l_out), :][:, :c_in]
                             for t in range(k)]
                    fill = c_pad - k * c_in
                    if fill:
                        parts.append(jnp.zeros((l_out, fill), jnp.float32))
                    xb = parts[0] if len(parts) == 1 else jnp.concatenate(parts, axis=-1)
                else:
                    # wide fallback: full-width taps at 128-aligned offsets -> Kc = k*c_pad
                    parts = [buf_ref[b, pl.ds(t * d, l_out), :] for t in range(k)]
                    xb = parts[0] if len(parts) == 1 else jnp.concatenate(parts, axis=-1)
                blocks.append(xb)
            xs = blocks[0] if tb == 1 else jnp.concatenate(blocks, axis=0)

            # ---- one MXU matmul per layer (bf16 operands, f32 acc) + bias/ReLU.
            w_ref = conv_refs[2 * i]
            bias_ref = conv_refs[2 * i + 1]
            acc = jnp.dot(xs.astype(mxu_dtype), w_ref[...],
                          preferred_element_type=jnp.float32)
            h = jnp.maximum(acc + bias_ref[...], 0.0)
            # nn.Dropout: identity at inference.

        # ---- fused final Linear; lane-dense (l_last, out_pad) unmasked stores.
        y = jnp.dot(h.astype(mxu_dtype), lin_w_ref[...],
                    preferred_element_type=jnp.float32) + lin_b_ref[...]
        for b in range(tb):
            o_ref[b] = y[b * l_last:(b + 1) * l_last, :].astype(o_ref.dtype)

    return kernel


# ---------------------------------------------------------------------------
# One-time weight packing (hoisted out of the per-call path).
# ---------------------------------------------------------------------------
def pack_tcn_params(params, kernel_size):
    convs = params["convs"]                       # list of (w (k,Cin,Cout), b (Cout,), dilation)
    lin_w, lin_b = params["lin_w"], params["lin_b"]
    k = kernel_size

    chans = [convs[0][0].shape[1]] + [w.shape[2] for (w, _, _) in convs]
    c_pad = _ceil_to(max(chans), LANE)
    out_dim = lin_w.shape[1]
    out_pad = _ceil_to(out_dim, LANE)

    conv_w, conv_b, dils, modes, c_prev = [], [], [], [], []
    for (w, b, d) in convs:
        _, cin, cout = w.shape
        tight = (k * cin <= c_pad)
        if tight:
            # W_cat[t*cin + c, co] = w[t, c, co]  -> matches lane-tight im2col order
            wc = jnp.zeros((c_pad, c_pad), jnp.float32)
            wc = wc.at[:k * cin, :cout].set(w.reshape(k * cin, cout))
        else:
            wc = jnp.zeros((k * c_pad, c_pad), jnp.float32)
            for t in range(k):
                wc = wc.at[t * c_pad:t * c_pad + cin, :cout].set(w[t])
        conv_w.append(wc.astype(jnp.bfloat16))
        conv_b.append(jnp.pad(b.astype(jnp.float32), (0, c_pad - cout)).reshape(1, c_pad))
        dils.append(int(d))
        modes.append("tight" if tight else "wide")
        c_prev.append(int(cin))

    lw = jnp.zeros((c_pad, out_pad), jnp.float32)
    lw = lw.at[:lin_w.shape[0], :out_dim].set(lin_w).astype(jnp.bfloat16)
    lb = jnp.pad(lin_b.astype(jnp.float32), (0, out_pad - out_dim)).reshape(1, out_pad)

    return {"k": k, "c_pad": c_pad, "out_pad": out_pad, "out_dim": out_dim,
            "conv_w": conv_w, "conv_b": conv_b, "dilations": dils,
            "modes": modes, "c_prev": c_prev, "lin_w": lw, "lin_b": lb}


def _pick_tb(batch, seq):
    """Fold TB batch elements per grid step: grow matmul M toward >=256 while
    keeping >= 2 parallel grid steps when the batch allows (feeds both v7x TCs)."""
    divs = [d for d in range(1, batch + 1) if batch % d == 0]
    cand = [d for d in divs if batch // d >= 2] or divs
    for d in cand:
        if d * seq >= 256:
            return d
    return cand[-1]


# ---------------------------------------------------------------------------
# Forward wrapper: geometry + BlockSpecs + the single fused pallas_call.
# ---------------------------------------------------------------------------
def tcn_forward(x, packed):
    B, L, c_in0 = x.shape
    k, c_pad = packed["k"], packed["c_pad"]
    out_pad, out_dim = packed["out_pad"], packed["out_dim"]
    assert c_in0 == packed["c_prev"][0], "input channels mismatch"

    # Static per-layer geometry (PyTorch Conv1d output-length formula).
    cfg, l_in, halo_rows = [], L, 8
    for i, d in enumerate(packed["dilations"]):
        p = d * (k - 1) // 2
        l_out = l_in + 2 * p - d * (k - 1)
        cfg.append((d, p, l_in, l_out, packed["c_prev"][i], packed["modes"][i]))
        halo_rows = max(halo_rows, l_in + 2 * p)
        l_in = l_out
    l_last = l_in
    halo_rows = _ceil_to(halo_rows, 8)

    tb = _pick_tb(B, L)

    inputs = [x]
    in_specs = [pl.BlockSpec((tb, L, c_in0), lambda g: (g, 0, 0))]
    for wi, bi in zip(packed["conv_w"], packed["conv_b"]):
        inputs += [wi, bi]
        in_specs += [pl.BlockSpec(wi.shape, lambda g: (0, 0)),
                     pl.BlockSpec(bi.shape, lambda g: (0, 0))]
    inputs += [packed["lin_w"], packed["lin_b"]]
    in_specs += [pl.BlockSpec(packed["lin_w"].shape, lambda g: (0, 0)),
                 pl.BlockSpec(packed["lin_b"].shape, lambda g: (0, 0))]

    # Advisory cost estimate for XLA scheduling around the custom call.
    flops = 0
    for (d, p, li, lo, cp, mode) in cfg:
        kc = c_pad if mode == "tight" else k * c_pad
        flops += 2 * B * lo * kc * c_pad
    flops += 2 * B * l_last * c_pad * out_pad
    bytes_accessed = int(x.size * x.dtype.itemsize
                         + sum(int(a.size) * a.dtype.itemsize for a in inputs[1:])
                         + B * l_last * out_pad * 4)

    # Explicit VMEM budget (double-buffered in/out blocks + scratch), capped at
    # v7x's 64 MiB physical VMEM.
    per_step_in = tb * L * c_in0 * 4 + sum(int(a.size) * a.dtype.itemsize
                                           for a in inputs[1:])
    per_step_out = tb * l_last * out_pad * 4
    est = 2 * (per_step_in + per_step_out) + tb * halo_rows * c_pad * 4
    vmem_limit = int(min(max(32 * 2 ** 20, 2 * est), 64 * 2 ** 20))

    kern = _make_fused_kernel(tuple(cfg), k, c_pad, tb, l_last)
    out = pl.pallas_call(
        kern,
        out_shape=jax.ShapeDtypeStruct((B, l_last, out_pad), jnp.float32),
        grid=(B // tb,),
        in_specs=in_specs,
        out_specs=pl.BlockSpec((tb, l_last, out_pad), lambda g: (g, 0, 0)),
        scratch_shapes=[pltpu.VMEM((tb, halo_rows, c_pad), jnp.float32)],
        compiler_params=pltpu.CompilerParams(
            dimension_semantics=("parallel",),
            vmem_limit_bytes=vmem_limit),
        cost_estimate=pl.CostEstimate(flops=int(flops), transcendentals=0,
                                      bytes_accessed=bytes_accessed),
    )(*inputs)
    return out[:, :, :out_dim]          # drop lane padding of the output


# ---------------------------------------------------------------------------
# Deterministic synthetic parameters (conv weights as (k, Cin, Cout); linear as
# (Cin, Cout) — same math as the PyTorch module).
# ---------------------------------------------------------------------------
def init_tcn_params(key, input_size, output_size, num_channels, kernel_size):
    params = {"convs": []}
    for i, out_ch in enumerate(num_channels):
        dilation = 2 ** i
        in_ch = input_size if i == 0 else num_channels[i - 1]
        key, kw, kb = jax.random.split(key, 3)
        bound = 1.0 / (in_ch * kernel_size) ** 0.5
        w = jax.random.uniform(kw, (kernel_size, in_ch, out_ch), jnp.float32,
                               -bound, bound)
        b = jax.random.uniform(kb, (out_ch,), jnp.float32, -bound, bound)
        params["convs"].append((w, b, dilation))
    key, kw, kb = jax.random.split(key, 3)
    bound = 1.0 / num_channels[-1] ** 0.5
    params["lin_w"] = jax.random.uniform(kw, (num_channels[-1], output_size),
                                         jnp.float32, -bound, bound)
    params["lin_b"] = jax.random.uniform(kb, (output_size,), jnp.float32,
                                         -bound, bound)
    return params


# ---------------------------------------------------------------------------
# Pure-JAX reference (no Pallas).  Matmul operands cast to bf16 to mirror the
# kernel's (and TPU default f32 matmul's) operand rounding; f32 accumulation,
# f32 bias/ReLU — same math as the PyTorch module up to precision.
# ---------------------------------------------------------------------------
def tcn_reference(x, params, kernel_size, mxu_dtype=jnp.bfloat16):
    h = x.astype(jnp.float32)
    for (w, b, dilation) in params["convs"]:
        pad = dilation * (kernel_size - 1) // 2
        L = h.shape[1]
        l_out = L + 2 * pad - dilation * (kernel_size - 1)
        hp = jnp.pad(h, ((0, 0), (pad, pad), (0, 0)))
        acc = jnp.zeros((h.shape[0], l_out, w.shape[-1]), jnp.float32)
        for t in range(kernel_size):
            acc = acc + jnp.einsum(
                "blc,co->blo",
                hp[:, t * dilation:t * dilation + l_out, :].astype(mxu_dtype),
                w[t].astype(mxu_dtype),
                preferred_element_type=jnp.float32)
        h = jnp.maximum(acc + b[None, None, :], 0.0)
    y = jnp.einsum("blc,co->blo", h.astype(mxu_dtype),
                   params["lin_w"].astype(mxu_dtype),
                   preferred_element_type=jnp.float32)
    return y + params["lin_b"]


if __name__ == "__main__":
    B, L = 4, 16                     # B=4 -> TB=2 batch folding AND 2 parallel grid steps
    input_size, output_size = 8, 4
    num_channels = [16, 16]          # two levels -> dilations 1, 2
    kernel_size = 3
    dropout = 0.1                    # inference: identity

    key = jax.random.PRNGKey(0)
    kx, kp = jax.random.split(key)
    x = jax.random.normal(kx, (B, L, input_size), jnp.float32)
    params = init_tcn_params(kp, input_size, output_size, num_channels, kernel_size)
    packed = pack_tcn_params(params, kernel_size)   # one-time packing (not per call)

    out = tcn_forward(x, packed)
    out = jax.block_until_ready(out)

    ref = tcn_reference(x, params, kernel_size)
    assert out.shape == (B, L, output_size), out.shape
    assert jnp.allclose(out, ref, atol=5e-3, rtol=5e-3), \
        float(jnp.max(jnp.abs(out - ref)))

    print("KERNEL_OK")
</pallas_src>

<mosaic_0001>
module attributes {stable_mosaic.version = 11 : i64} {
  func.func @kernel(%arg0: i32, %arg1: memref<2x16x8xf32, #tpu.memory_space<vmem>>, %arg2: memref<128x128xbf16, #tpu.memory_space<vmem>>, %arg3: memref<1x128xf32, #tpu.memory_space<vmem>>, %arg4: memref<128x128xbf16, #tpu.memory_space<vmem>>, %arg5: memref<1x128xf32, #tpu.memory_space<vmem>>, %arg6: memref<128x128xbf16, #tpu.memory_space<vmem>>, %arg7: memref<1x128xf32, #tpu.memory_space<vmem>>, %arg8: memref<2x16x128xf32, #tpu.memory_space<vmem>>, %arg9: memref<2x24x128xf32, #tpu.memory_space<vmem>>) attributes {dimension_semantics = [#tpu.dimension_semantics<parallel>], iteration_bounds = array<i64: 2>, scalar_prefetch = 0 : i64, scratch_operands = 1 : i64, tpu.core_type = #tpu.core_type<tc>, window_params = [{transform_indices = @transform_0, window_bounds = array<i64: 2, 16, 8>}, {pipeline_mode = #tpu.pipeline_mode<synchronous>, transform_indices = @transform_1, window_bounds = array<i64: 128, 128>}, {pipeline_mode = #tpu.pipeline_mode<synchronous>, transform_indices = @transform_2, window_bounds = array<i64: 1, 128>}, {pipeline_mode = #tpu.pipeline_mode<synchronous>, transform_indices = @transform_3, window_bounds = array<i64: 128, 128>}, {pipeline_mode = #tpu.pipeline_mode<synchronous>, transform_indices = @transform_4, window_bounds = array<i64: 1, 128>}, {pipeline_mode = #tpu.pipeline_mode<synchronous>, transform_indices = @transform_5, window_bounds = array<i64: 128, 128>}, {pipeline_mode = #tpu.pipeline_mode<synchronous>, transform_indices = @transform_6, window_bounds = array<i64: 1, 128>}, {transform_indices = @transform_7, window_bounds = array<i64: 2, 16, 128>}]} {
    %c0 = arith.constant 0 : index
    %c0_0 = arith.constant 0 : index
    %c0_1 = arith.constant 0 : index
    %0 = vector.load %arg1[%c0, %c0_0, %c0_1] : memref<2x16x8xf32, #tpu.memory_space<vmem>>, vector<1x16x8xf32>
    %1 = vector.shape_cast %0 : vector<1x16x8xf32> to vector<16x8xf32>
    %cst = arith.constant 0.000000e+00 : f32
    %2 = vector.broadcast %cst : f32 to vector<16x120xf32>
    %3 = tpu.concatenate %1, %2 in 1 : vector<16x8xf32>, vector<16x120xf32> -> vector<16x128xf32>
    %cst_2 = arith.constant 0.000000e+00 : f32
    %4 = vector.broadcast %cst_2 : f32 to vector<1x128xf32>
    %c0_3 = arith.constant 0 : index
    %c0_4 = arith.constant 0 : index
    %c0_5 = arith.constant 0 : index
    %5 = vector.load %arg9[%c0_3, %c0_4, %c0_5] : memref<2x24x128xf32, #tpu.memory_space<vmem>>, vector<1x1x128xf32>
    %6 = vector.shape_cast %5 : vector<1x1x128xf32> to vector<1x128xf32>
    %7 = vector.shape_cast %4 : vector<1x128xf32> to vector<1x1x128xf32>
    tpu.vector_store %arg9[%c0_3, %c0_4, %c0_5], %7 {strides = array<i32>} : memref<2x24x128xf32, #tpu.memory_space<vmem>>, vector<1x1x128xf32>,
    %cst_6 = arith.constant 0.000000e+00 : f32
    %8 = vector.broadcast %cst_6 : f32 to vector<1x128xf32>
    %c0_7 = arith.constant 0 : index
    %c17 = arith.constant 17 : index
    %c0_8 = arith.constant 0 : index
    %9 = vector.load %arg9[%c0_7, %c17, %c0_8] : memref<2x24x128xf32, #tpu.memory_space<vmem>>, vector<1x1x128xf32>
    %10 = vector.shape_cast %9 : vector<1x1x128xf32> to vector<1x128xf32>
    %11 = vector.shape_cast %8 : vector<1x128xf32> to vector<1x1x128xf32>
    tpu.vector_store %arg9[%c0_7, %c17, %c0_8], %11 {strides = array<i32>} : memref<2x24x128xf32, #tpu.memory_space<vmem>>, vector<1x1x128xf32>,
    %c0_9 = arith.constant 0 : index
    %c1 = arith.constant 1 : index
    %c0_10 = arith.constant 0 : index
    %12 = vector.load %arg9[%c0_9, %c1, %c0_10] : memref<2x24x128xf32, #tpu.memory_space<vmem>>, vector<1x16x128xf32>
    %13 = vector.shape_cast %12 : vector<1x16x128xf32> to vector<16x128xf32>
    %14 = vector.shape_cast %3 : vector<16x128xf32> to vector<1x16x128xf32>
    tpu.vector_store %arg9[%c0_9, %c1, %c0_10], %14 {strides = array<i32>} : memref<2x24x128xf32, #tpu.memory_space<vmem>>, vector<1x16x128xf32>,
    %c1_11 = arith.constant 1 : index
    %c0_12 = arith.constant 0 : index
    %c0_13 = arith.constant 0 : index
    %15 = vector.load %arg1[%c1_11, %c0_12, %c0_13] : memref<2x16x8xf32, #tpu.memory_space<vmem>>, vector<1x16x8xf32>
    %16 = vector.shape_cast %15 : vector<1x16x8xf32> to vector<16x8xf32>
    %cst_14 = arith.constant 0.000000e+00 : f32
    %17 = vector.broadcast %cst_14 : f32 to vector<16x120xf32>
    %18 = tpu.concatenate %16, %17 in 1 : vector<16x8xf32>, vector<16x120xf32> -> vector<16x128xf32>
    %cst_15 = arith.constant 0.000000e+00 : f32
    %19 = vector.broadcast %cst_15 : f32 to vector<1x128xf32>
    %c1_16 = arith.constant 1 : index
    %c0_17 = arith.constant 0 : index
    %c0_18 = arith.constant 0 : index
    %20 = vector.load %arg9[%c1_16, %c0_17, %c0_18] : memref<2x24x128xf32, #tpu.memory_space<vmem>>, vector<1x1x128xf32>
    %21 = vector.shape_cast %20 : vector<1x1x128xf32> to vector<1x128xf32>
    %22 = vector.shape_cast %19 : vector<1x128xf32> to vector<1x1x128xf32>
    tpu.vector_store %arg9[%c1_16, %c0_17, %c0_18], %22 {strides = array<i32>} : memref<2x24x128xf32, #tpu.memory_space<vmem>>, vector<1x1x128xf32>,
    %cst_19 = arith.constant 0.000000e+00 : f32
    %23 = vector.broadcast %cst_19 : f32 to vector<1x128xf32>
    %c1_20 = arith.constant 1 : index
    %c17_21 = arith.constant 17 : index
    %c0_22 = arith.constant 0 : index
    %24 = vector.load %arg9[%c1_20, %c17_21, %c0_22] : memref<2x24x128xf32, #tpu.memory_space<vmem>>, vector<1x1x128xf32>
    %25 = vector.shape_cast %24 : vector<1x1x128xf32> to vector<1x128xf32>
    %26 = vector.shape_cast %23 : vector<1x128xf32> to vector<1x1x128xf32>
    tpu.vector_store %arg9[%c1_20, %c17_21, %c0_22], %26 {strides = array<i32>} : memref<2x24x128xf32, #tpu.memory_space<vmem>>, vector<1x1x128xf32>,
    %c1_23 = arith.constant 1 : index
    %c1_24 = arith.constant 1 : index
    %c0_25 = arith.constant 0 : index
    %27 = vector.load %arg9[%c1_23, %c1_24, %c0_25] : memref<2x24x128xf32, #tpu.memory_space<vmem>>, vector<1x16x128xf32>
    %28 = vector.shape_cast %27 : vector<1x16x128xf32> to vector<16x128xf32>
    %29 = vector.shape_cast %18 : vector<16x128xf32> to vector<1x16x128xf32>
    tpu.vector_store %arg9[%c1_23, %c1_24, %c0_25], %29 {strides = array<i32>} : memref<2x24x128xf32, #tpu.memory_space<vmem>>, vector<1x16x128xf32>,
    %c0_26 = arith.constant 0 : index
    %c0_27 = arith.constant 0 : index
    %c0_28 = arith.constant 0 : index
    %30 = vector.load %arg9[%c0_26, %c0_27, %c0_28] : memref<2x24x128xf32, #tpu.memory_space<vmem>>, vector<1x16x128xf32>
    %31 = vector.shape_cast %30 : vector<1x16x128xf32> to vector<16x128xf32>
    %32 = vector.extract_strided_slice %31 {offsets = [0, 0], sizes = [16, 8], strides = [1, 1]} : vector<16x128xf32> to vector<16x8xf32>
    %c0_29 = arith.constant 0 : index
    %c1_30 = arith.constant 1 : index
    %c0_31 = arith.constant 0 : index
    %33 = vector.load %arg9[%c0_29, %c1_30, %c0_31] : memref<2x24x128xf32, #tpu.memory_space<vmem>>, vector<1x16x128xf32>
    %34 = vector.shape_cast %33 : vector<1x16x128xf32> to vector<16x128xf32>
    %35 = vector.extract_strided_slice %34 {offsets = [0, 0], sizes = [16, 8], strides = [1, 1]} : vector<16x128xf32> to vector<16x8xf32>
    %c0_32 = arith.constant 0 : index
    %c2 = arith.constant 2 : index
    %c0_33 = arith.constant 0 : index
    %36 = vector.load %arg9[%c0_32, %c2, %c0_33] : memref<2x24x128xf32, #tpu.memory_space<vmem>>, vector<1x16x128xf32>
    %37 = vector.shape_cast %36 : vector<1x16x128xf32> to vector<16x128xf32>
    %38 = vector.extract_strided_slice %37 {offsets = [0, 0], sizes = [16, 8], strides = [1, 1]} : vector<16x128xf32> to vector<16x8xf32>
    %cst_34 = arith.constant 0.000000e+00 : f32
    %39 = vector.broadcast %cst_34 : f32 to vector<16x104xf32>
    %40 = tpu.concatenate %32, %35, %38, %39 in 1 : vector<16x8xf32>, vector<16x8xf32>, vector<16x8xf32>, vector<16x104xf32> -> vector<16x128xf32>
    %c1_35 = arith.constant 1 : index
    %c0_36 = arith.constant 0 : index
    %c0_37 = arith.constant 0 : index
    %41 = vector.load %arg9[%c1_35, %c0_36, %c0_37] : memref<2x24x128xf32, #tpu.memory_space<vmem>>, vector<1x16x128xf32>
    %42 = vector.shape_cast %41 : vector<1x16x128xf32> to vector<16x128xf32>
    %43 = vector.extract_strided_slice %42 {offsets = [0, 0], sizes = [16, 8], strides = [1, 1]} : vector<16x128xf32> to vector<16x8xf32>
    %c1_38 = arith.constant 1 : index
    %c1_39 = arith.constant 1 : index
    %c0_40 = arith.constant 0 : index
    %44 = vector.load %arg9[%c1_38, %c1_39, %c0_40] : memref<2x24x128xf32, #tpu.memory_space<vmem>>, vector<1x16x128xf32>
    %45 = vector.shape_cast %44 : vector<1x16x128xf32> to vector<16x128xf32>
    %46 = vector.extract_strided_slice %45 {offsets = [0, 0], sizes = [16, 8], strides = [1, 1]} : vector<16x128xf32> to vector<16x8xf32>
    %c1_41 = arith.constant 1 : index
    %c2_42 = arith.constant 2 : index
    %c0_43 = arith.constant 0 : index
    %47 = vector.load %arg9[%c1_41, %c2_42, %c0_43] : memref<2x24x128xf32, #tpu.memory_space<vmem>>, vector<1x16x128xf32>
    %48 = vector.shape_cast %47 : vector<1x16x128xf32> to vector<16x128xf32>
    %49 = vector.extract_strided_slice %48 {offsets = [0, 0], sizes = [16, 8], strides = [1, 1]} : vector<16x128xf32> to vector<16x8xf32>
    %cst_44 = arith.constant 0.000000e+00 : f32
    %50 = vector.broadcast %cst_44 : f32 to vector<16x104xf32>
    %51 = tpu.concatenate %43, %46, %49, %50 in 1 : vector<16x8xf32>, vector<16x8xf32>, vector<16x8xf32>, vector<16x104xf32> -> vector<16x128xf32>
    %52 = tpu.concatenate %40, %51 in 0 : vector<16x128xf32>, vector<16x128xf32> -> vector<32x128xf32>
    %53 = arith.truncf %52 : vector<32x128xf32> to vector<32x128xbf16>
    %c0_45 = arith.constant 0 : index
    %c0_46 = arith.constant 0 : index
    %54 = vector.load %arg2[%c0_45, %c0_46] : memref<128x128xbf16, #tpu.memory_space<vmem>>, vector<128x128xbf16>
    %cst_47 = arith.constant dense<0.000000e+00> : vector<32x128xf32>
    %55 = tpu.matmul %53, %54, %cst_47 {dimension_numbers = #tpu.dot_dimension_numbers<[1], [0], [0], [1], [0, 0, 1, 1], [], []>} : vector<32x128xbf16>, vector<128x128xbf16>, vector<32x128xf32> -> vector<32x128xf32>
    %c0_48 = arith.constant 0 : index
    %c0_49 = arith.constant 0 : index
    %56 = vector.load %arg3[%c0_48, %c0_49] : memref<1x128xf32, #tpu.memory_space<vmem>>, vector<1x128xf32>
    %57 = vector.broadcast %56 : vector<1x128xf32> to vector<32x128xf32>
    %58 = arith.addf %55, %57 : vector<32x128xf32>
    %cst_50 = arith.constant 0.000000e+00 : f32
    %59 = vector.broadcast %cst_50 : f32 to vector<32x128xf32>
    %60 = arith.maximumf %58, %59 : vector<32x128xf32>
    %61 = vector.extract_strided_slice %60 {offsets = [0, 0], sizes = [16, 128], strides = [1, 1]} : vector<32x128xf32> to vector<16x128xf32>
    %cst_51 = arith.constant 0.000000e+00 : f32
    %62 = vector.broadcast %cst_51 : f32 to vector<2x128xf32>
    %c0_52 = arith.constant 0 : index
    %c0_53 = arith.constant 0 : index
    %c0_54 = arith.constant 0 : index
    %63 = vector.load %arg9[%c0_52, %c0_53, %c0_54] : memref<2x24x128xf32, #tpu.memory_space<vmem>>, vector<1x2x128xf32>
    %64 = vector.shape_cast %63 : vector<1x2x128xf32> to vector<2x128xf32>
    %65 = vector.shape_cast %62 : vector<2x128xf32> to vector<1x2x128xf32>
    tpu.vector_store %arg9[%c0_52, %c0_53, %c0_54], %65 {strides = array<i32>} : memref<2x24x128xf32, #tpu.memory_space<vmem>>, vector<1x2x128xf32>,
    %cst_55 = arith.constant 0.000000e+00 : f32
    %66 = vector.broadcast %cst_55 : f32 to vector<2x128xf32>
    %c0_56 = arith.constant 0 : index
    %c18 = arith.constant 18 : index
    %c0_57 = arith.constant 0 : index
    %67 = vector.load %arg9[%c0_56, %c18, %c0_57] : memref<2x24x128xf32, #tpu.memory_space<vmem>>, vector<1x2x128xf32>
    %68 = vector.shape_cast %67 : vector<1x2x128xf32> to vector<2x128xf32>
    %69 = vector.shape_cast %66 : vector<2x128xf32> to vector<1x2x128xf32>
    tpu.vector_store %arg9[%c0_56, %c18, %c0_57], %69 {strides = array<i32>} : memref<2x24x128xf32, #tpu.memory_space<vmem>>, vector<1x2x128xf32>,
    %c0_58 = arith.constant 0 : index
    %c2_59 = arith.constant 2 : index
    %c0_60 = arith.constant 0 : index
    %70 = vector.load %arg9[%c0_58, %c2_59, %c0_60] : memref<2x24x128xf32, #tpu.memory_space<vmem>>, vector<1x16x128xf32>
    %71 = vector.shape_cast %70 : vector<1x16x128xf32> to vector<16x128xf32>
    %72 = vector.shape_cast %61 : vector<16x128xf32> to vector<1x16x128xf32>
    tpu.vector_store %arg9[%c0_58, %c2_59, %c0_60], %72 {strides = array<i32>} : memref<2x24x128xf32, #tpu.memory_space<vmem>>, vector<1x16x128xf32>,
    %73 = vector.extract_strided_slice %60 {offsets = [16, 0], sizes = [16, 128], strides = [1, 1]} : vector<32x128xf32> to vector<16x128xf32>
    %cst_61 = arith.constant 0.000000e+00 : f32
    %74 = vector.broadcast %cst_61 : f32 to vector<2x128xf32>
    %c1_62 = arith.constant 1 : index
    %c0_63 = arith.constant 0 : index
    %c0_64 = arith.constant 0 : index
    %75 = vector.load %arg9[%c1_62, %c0_63, %c0_64] : memref<2x24x128xf32, #tpu.memory_space<vmem>>, vector<1x2x128xf32>
    %76 = vector.shape_cast %75 : vector<1x2x128xf32> to vector<2x128xf32>
    %77 = vector.shape_cast %74 : vector<2x128xf32> to vector<1x2x128xf32>
    tpu.vector_store %arg9[%c1_62, %c0_63, %c0_64], %77 {strides = array<i32>} : memref<2x24x128xf32, #tpu.memory_space<vmem>>, vector<1x2x128xf32>,
    %cst_65 = arith.constant 0.000000e+00 : f32
    %78 = vector.broadcast %cst_65 : f32 to vector<2x128xf32>
    %c1_66 = arith.constant 1 : index
    %c18_67 = arith.constant 18 : index
    %c0_68 = arith.constant 0 : index
    %79 = vector.load %arg9[%c1_66, %c18_67, %c0_68] : memref<2x24x128xf32, #tpu.memory_space<vmem>>, vector<1x2x128xf32>
    %80 = vector.shape_cast %79 : vector<1x2x128xf32> to vector<2x128xf32>
    %81 = vector.shape_cast %78 : vector<2x128xf32> to vector<1x2x128xf32>
    tpu.vector_store %arg9[%c1_66, %c18_67, %c0_68], %81 {strides = array<i32>} : memref<2x24x128xf32, #tpu.memory_space<vmem>>, vector<1x2x128xf32>,
    %c1_69 = arith.constant 1 : index
    %c2_70 = arith.constant 2 : index
    %c0_71 = arith.constant 0 : index
    %82 = vector.load %arg9[%c1_69, %c2_70, %c0_71] : memref<2x24x128xf32, #tpu.memory_space<vmem>>, vector<1x16x128xf32>
    %83 = vector.shape_cast %82 : vector<1x16x128xf32> to vector<16x128xf32>
    %84 = vector.shape_cast %73 : vector<16x128xf32> to vector<1x16x128xf32>
    tpu.vector_store %arg9[%c1_69, %c2_70, %c0_71], %84 {strides = array<i32>} : memref<2x24x128xf32, #tpu.memory_space<vmem>>, vector<1x16x128xf32>,
    %c0_72 = arith.constant 0 : index
    %c0_73 = arith.constant 0 : index
    %c0_74 = arith.constant 0 : index
    %85 = vector.load %arg9[%c0_72, %c0_73, %c0_74] : memref<2x24x128xf32, #tpu.memory_space<vmem>>, vector<1x16x128xf32>
    %86 = vector.shape_cast %85 : vector<1x16x128xf32> to vector<16x128xf32>
    %87 = vector.extract_strided_slice %86 {offsets = [0, 0], sizes = [16, 16], strides = [1, 1]} : vector<16x128xf32> to vector<16x16xf32>
    %c0_75 = arith.constant 0 : index
    %c2_76 = arith.constant 2 : index
    %c0_77 = arith.constant 0 : index
    %88 = vector.load %arg9[%c0_75, %c2_76, %c0_77] : memref<2x24x128xf32, #tpu.memory_space<vmem>>, vector<1x16x128xf32>
    %89 = vector.shape_cast %88 : vector<1x16x128xf32> to vector<16x128xf32>
    %90 = vector.extract_strided_slice %89 {offsets = [0, 0], sizes = [16, 16], strides = [1, 1]} : vector<16x128xf32> to vector<16x16xf32>
    %c0_78 = arith.constant 0 : index
    %c4 = arith.constant 4 : index
    %c0_79 = arith.constant 0 : index
    %91 = vector.load %arg9[%c0_78, %c4, %c0_79] : memref<2x24x128xf32, #tpu.memory_space<vmem>>, vector<1x16x128xf32>
    %92 = vector.shape_cast %91 : vector<1x16x128xf32> to vector<16x128xf32>
    %93 = vector.extract_strided_slice %92 {offsets = [0, 0], sizes = [16, 16], strides = [1, 1]} : vector<16x128xf32> to vector<16x16xf32>
    %cst_80 = arith.constant 0.000000e+00 : f32
    %94 = vector.broadcast %cst_80 : f32 to vector<16x80xf32>
    %95 = tpu.concatenate %87, %90, %93, %94 in 1 : vector<16x16xf32>, vector<16x16xf32>, vector<16x16xf32>, vector<16x80xf32> -> vector<16x128xf32>
    %c1_81 = arith.constant 1 : index
    %c0_82 = arith.constant 0 : index
    %c0_83 = arith.constant 0 : index
    %96 = vector.load %arg9[%c1_81, %c0_82, %c0_83] : memref<2x24x128xf32, #tpu.memory_space<vmem>>, vector<1x16x128xf32>
    %97 = vector.shape_cast %96 : vector<1x16x128xf32> to vector<16x128xf32>
    %98 = vector.extract_strided_slice %97 {offsets = [0, 0], sizes = [16, 16], strides = [1, 1]} : vector<16x128xf32> to vector<16x16xf32>
    %c1_84 = arith.constant 1 : index
    %c2_85 = arith.constant 2 : index
    %c0_86 = arith.constant 0 : index
    %99 = vector.load %arg9[%c1_84, %c2_85, %c0_86] : memref<2x24x128xf32, #tpu.memory_space<vmem>>, vector<1x16x128xf32>
    %100 = vector.shape_cast %99 : vector<1x16x128xf32> to vector<16x128xf32>
    %101 = vector.extract_strided_slice %100 {offsets = [0, 0], sizes = [16, 16], strides = [1, 1]} : vector<16x128xf32> to vector<16x16xf32>
    %c1_87 = arith.constant 1 : index
    %c4_88 = arith.constant 4 : index
    %c0_89 = arith.constant 0 : index
    %102 = vector.load %arg9[%c1_87, %c4_88, %c0_89] : memref<2x24x128xf32, #tpu.memory_space<vmem>>, vector<1x16x128xf32>
    %103 = vector.shape_cast %102 : vector<1x16x128xf32> to vector<16x128xf32>
    %104 = vector.extract_strided_slice %103 {offsets = [0, 0], sizes = [16, 16], strides = [1, 1]} : vector<16x128xf32> to vector<16x16xf32>
    %cst_90 = arith.constant 0.000000e+00 : f32
    %105 = vector.broadcast %cst_90 : f32 to vector<16x80xf32>
    %106 = tpu.concatenate %98, %101, %104, %105 in 1 : vector<16x16xf32>, vector<16x16xf32>, vector<16x16xf32>, vector<16x80xf32> -> vector<16x128xf32>
    %107 = tpu.concatenate %95, %106 in 0 : vector<16x128xf32>, vector<16x128xf32> -> vector<32x128xf32>
    %108 = arith.truncf %107 : vector<32x128xf32> to vector<32x128xbf16>
    %c0_91 = arith.constant 0 : index
    %c0_92 = arith.constant 0 : index
    %109 = vector.load %arg4[%c0_91, %c0_92] : memref<128x128xbf16, #tpu.memory_space<vmem>>, vector<128x128xbf16>
    %cst_93 = arith.constant dense<0.000000e+00> : vector<32x128xf32>
    %110 = tpu.matmul %108, %109, %cst_93 {dimension_numbers = #tpu.dot_dimension_numbers<[1], [0], [0], [1], [0, 0, 1, 1], [], []>} : vector<32x128xbf16>, vector<128x128xbf16>, vector<32x128xf32> -> vector<32x128xf32>
    %c0_94 = arith.constant 0 : index
    %c0_95 = arith.constant 0 : index
    %111 = vector.load %arg5[%c0_94, %c0_95] : memref<1x128xf32, #tpu.memory_space<vmem>>, vector<1x128xf32>
    %112 = vector.broadcast %111 : vector<1x128xf32> to vector<32x128xf32>
    %113 = arith.addf %110, %112 : vector<32x128xf32>
    %cst_96 = arith.constant 0.000000e+00 : f32
    %114 = vector.broadcast %cst_96 : f32 to vector<32x128xf32>
    %115 = arith.maximumf %113, %114 : vector<32x128xf32>
    %116 = arith.truncf %115 : vector<32x128xf32> to vector<32x128xbf16>
    %c0_97 = arith.constant 0 : index
    %c0_98 = arith.constant 0 : index
    %117 = vector.load %arg6[%c0_97, %c0_98] : memref<128x128xbf16, #tpu.memory_space<vmem>>, vector<128x128xbf16>
    %cst_99 = arith.constant dense<0.000000e+00> : vector<32x128xf32>
    %118 = tpu.matmul %116, %117, %cst_99 {dimension_numbers = #tpu.dot_dimension_numbers<[1], [0], [0], [1], [0, 0, 1, 1], [], []>} : vector<32x128xbf16>, vector<128x128xbf16>, vector<32x128xf32> -> vector<32x128xf32>
    %c0_100 = arith.constant 0 : index
    %c0_101 = arith.constant 0 : index
    %119 = vector.load %arg7[%c0_100, %c0_101] : memref<1x128xf32, #tpu.memory_space<vmem>>, vector<1x128xf32>
    %120 = vector.broadcast %119 : vector<1x128xf32> to vector<32x128xf32>
    %121 = arith.addf %118, %120 : vector<32x128xf32>
    %122 = vector.extract_strided_slice %121 {offsets = [0, 0], sizes = [16, 128], strides = [1, 1]} : vector<32x128xf32> to vector<16x128xf32>
    %c0_102 = arith.constant 0 : index
    %c0_103 = arith.constant 0 : index
    %c0_104 = arith.constant 0 : index
    %123 = vector.load %arg8[%c0_102, %c0_103, %c0_104] : memref<2x16x128xf32, #tpu.memory_space<vmem>>, vector<1x16x128xf32>
    %124 = vector.shape_cast %123 : vector<1x16x128xf32> to vector<16x128xf32>
    %125 = vector.shape_cast %122 : vector<16x128xf32> to vector<1x16x128xf32>
    tpu.vector_store %arg8[%c0_102, %c0_103, %c0_104], %125 {strides = array<i32>} : memref<2x16x128xf32, #tpu.memory_space<vmem>>, vector<1x16x128xf32>,
    %126 = vector.extract_strided_slice %121 {offsets = [16, 0], sizes = [16, 128], strides = [1, 1]} : vector<32x128xf32> to vector<16x128xf32>
    %c1_105 = arith.constant 1 : index
    %c0_106 = arith.constant 0 : index
    %c0_107 = arith.constant 0 : index
    %127 = vector.load %arg8[%c1_105, %c0_106, %c0_107] : memref<2x16x128xf32, #tpu.memory_space<vmem>>, vector<1x16x128xf32>
    %128 = vector.shape_cast %127 : vector<1x16x128xf32> to vector<16x128xf32>
    %129 = vector.shape_cast %126 : vector<16x128xf32> to vector<1x16x128xf32>
    tpu.vector_store %arg8[%c1_105, %c0_106, %c0_107], %129 {strides = array<i32>} : memref<2x16x128xf32, #tpu.memory_space<vmem>>, vector<1x16x128xf32>,
    return
  }
  func.func @transform_0(%arg0: i32) -> (i32, i32, i32) {
    %c0_i32 = arith.constant 0 : i32
    %c0_i32_0 = arith.constant 0 : i32
    %c0_i32_1 = arith.constant 0 : i32
    return %arg0, %c0_i32, %c0_i32_0 : i32, i32, i32
  }
  func.func @transform_1(%arg0: i32) -> (i32, i32) {
    %c0_i32 = arith.constant 0 : i32
    %c0_i32_0 = arith.constant 0 : i32
    %c0_i32_1 = arith.constant 0 : i32
    return %c0_i32, %c0_i32_0 : i32, i32
  }
  func.func @transform_2(%arg0: i32) -> (i32, i32) {
    %c0_i32 = arith.constant 0 : i32
    %c0_i32_0 = arith.constant 0 : i32
    %c0_i32_1 = arith.constant 0 : i32
    return %c0_i32, %c0_i32_0 : i32, i32
  }
  func.func @transform_3(%arg0: i32) -> (i32, i32) {
    %c0_i32 = arith.constant 0 : i32
    %c0_i32_0 = arith.constant 0 : i32
    %c0_i32_1 = arith.constant 0 : i32
    return %c0_i32, %c0_i32_0 : i32, i32
  }
  func.func @transform_4(%arg0: i32) -> (i32, i32) {
    %c0_i32 = arith.constant 0 : i32
    %c0_i32_0 = arith.constant 0 : i32
    %c0_i32_1 = arith.constant 0 : i32
    return %c0_i32, %c0_i32_0 : i32, i32
  }
  func.func @transform_5(%arg0: i32) -> (i32, i32) {
    %c0_i32 = arith.constant 0 : i32
    %c0_i32_0 = arith.constant 0 : i32
    %c0_i32_1 = arith.constant 0 : i32
    return %c0_i32, %c0_i32_0 : i32, i32
  }
  func.func @transform_6(%arg0: i32) -> (i32, i32) {
    %c0_i32 = arith.constant 0 : i32
    %c0_i32_0 = arith.constant 0 : i32
    %c0_i32_1 = arith.constant 0 : i32
    return %c0_i32, %c0_i32_0 : i32, i32
  }
  func.func @transform_7(%arg0: i32) -> (i32, i32, i32) {
    %c0_i32 = arith.constant 0 : i32
    %c0_i32_0 = arith.constant 0 : i32
    %c0_i32_1 = arith.constant 0 : i32
    return %arg0, %c0_i32, %c0_i32_0 : i32, i32, i32
  }
}

</mosaic_0001>

<bundles_post_ra>
// kernel: tpu_custom_call.1
= control target key start
LH: loop header
LB: loop body
LE: loop exit
PB: predicated region body
PF: predicated region fallthrough
CT: control target
= control target key end

     0   :  { %12 = vsyncpa [#allocation4], 0  ;;  %s1632_s0 = inlined_call_operand.vmem [shape: f32[4,16,8], index: 0, kind: input, shape index: {}]   ;;  %s1633_s1 = inlined_call_operand.vmem [shape: bf16[128,128], index: 1, kind: input, shape index: {}]   ;;  %s1634_s2 = inlined_call_operand.vmem [shape: f32[1,128], index: 2, kind: input, shape index: {}]   ;;  %s1635_s3 = inlined_call_operand.hbm [shape: bf16[128,128], index: 3, kind: input, shape index: {}]   ;;  %s1636_s4 = inlined_call_operand.vmem [shape: f32[1,128], index: 4, kind: input, shape index: {}]   ;;  %s1637_s5 = inlined_call_operand.hbm [shape: bf16[128,128], index: 5, kind: input, shape index: {}]   ;;  %s1638_s6 = inlined_call_operand.vmem [shape: f32[1,128], index: 6, kind: input, shape index: {}]   ;;  %s1639_s7 = inlined_call_operand.hbm [shape: f32[4,16,128], index: 7, kind: output, shape index: {}]  }
   0x1   :  { %13 = vsyncpa [#allocation7], 0 }
   0x2   :  { %14 = vsyncpa [#allocation5], 0 }
   0x3   :  { %16 = vsyncpa [#allocation5 + $0x1], 0  ;;  %s1398_s24 = smov 0   ;;  %s1400_s25 = smov 0  }
   0x4   :  { %s1402_s26 = smov 0   ;;  %s1404_s27 = smov 0  }
   0x5 LB: > { %s1419_s28 = sadd.s32 4294967295, %s1346_s27   ;;  %s935_s29 = sadd.s32 4294967294, %s1346_s27   ;;  %s1346_s27 = sphi %s1404_s27, %s1659_s27   ;;  %s1342_s26 = sphi %s1402_s26, %s1658_s26   ;;  %s1338_s25 = sphi %s1400_s25, %s1657_s25   ;;  %s1334_s24 = sphi %s1398_s24, %s1656_s24  }
   0x6   : > { %s1423_s30 = sadd.s32 1, %s1346_s27   ;;  %s181_s8 = sadd.s32 1, %s1342_s26 }
   0x7   : > { %s178_s9 = ssub.s32 %s1346_s27, %s1423_s30  ;;  %p191_p0 = scmp.ne.s32.totalorder %s1342_s26, %s1338_s25 }
   0x8   : > { %p179_p1 = scmp.eq.s32.totalorder %s178_s9, 0  ;;  %p192_p2 = scmp.eq.s32.totalorder %s1419_s28, 1 }
   0x9   : > { %p197_p3 = scmp.ne.s32.totalorder %s1338_s25, %s1334_s24  ;;  %p198_p4 = scmp.eq.s32.totalorder %s935_s29, 1 }
   0xa   : > { %s1434_s10 = scalar_select %p179_p1, %s1342_s26, %s181_s8  }
   0xb   : > { %p1436_p5 = por %p192_p2, %p191_p0  ;;  %p1440_p6 = por %p198_p4, %p197_p3 }
   0xc   : > { %1643 = sst [smem:[#allocation12_spill]] %s1434_s10  ;;  %p936_p7 = scmp.ge.s32.totalorder %s1346_s27, 1 }
   0xd   : > { %s1644_s11 = scalar_select %p1436_p5, 1, 0 }
   0xe   : > { %s1645_s12 = scalar_select %p1440_p6, 1, 0 }
   0xf   : > { %p205_p8 = scmp.lt.s32.totalorder %s1346_s27, 3  ;;  %p1640_p9 = scmp.eq.s32.totalorder %s1419_s28, 0 }
  0x10   : > { %s1348_s14 = smov [#allocation3]   ;;  %s1349_s17 = smov [#allocation6]  }
  0x11   : > { %p1447_p10 = pnand %p936_p7, %p205_p8  ;;  %s223_s15 = sshll.u32 %s1348_s14, 4  ;;  %s224_s15 = int_to_ptr.vmem [resolvable:$true] %s223_s15 }
  0x12   : > { %s239_s18 = sshll.u32 %s1349_s17, 4  ;;  %s1220_s21 = scalar_lea.hbm %s1635_s3, 1024  ;;  %s1459_s18 = int_to_ptr.vmem [resolvable:$true] %s239_s18 }
  0x13   : > { %s1646_s13 = scalar_select %p1447_p10, 1, 0 }
  0x14   : > { %p1099_p11 = pneg %p1447_p10  ;;  %p1221_p13 = scmp.ne.s32.totalorder %s1635_s3, %s1220_s21 }
  0x15   : > { %p1227_p3 = scmp.lt.u32.totalorder %s1220_s21, %s1635_s3 }
  0x16   : > { %p1455_p12 = pnand %p1640_p9, %p1099_p11 }
  0x18   : > { %p1222_p0 = pneg %p1455_p12 }
  0x1a   : > { %p1223_p1 = pnand %p1222_p0, %p1221_p13 }
  0x1c   : > { %p1224_p2 = pneg %p1223_p1 }
  0x1e   : > { %p1229_p4 = pnand %p1227_p3, %p1224_p2 }
  0x20   : > { %1232 = shalt.err (!%p1229_p4)
}
  0x21   : > { %s1233_s9 = scalar_lea.vmem %s224_s15, 1024  ;;  %p1241_p9 = scmp.lt.s32.totalorder %s224_s15, %s224_s15 }
  0x22   : > { %p1234_p7 = scmp.ne.s32.totalorder %s224_s15, %s1233_s9  ;;  %p1242_p6 = scmp.lt.s32.totalorder %s1233_s9, %s1233_s9 }
  0x24   : > { %p1236_p8 = pnand %p1234_p7, %p1222_p0  ;;  %p1243_p5 = por %p1242_p6, %p1241_p9 }
  0x26   : > { %p1237_p11 = pneg %p1236_p8 }
  0x28   : > { %p1244_p10 = pnand %p1243_p5, %p1237_p11 }
  0x2a   : > { %1247 = shalt.err (!%p1244_p10)
}
  0x2b   : > { %s1350_s14 = smov 64   ;;  %s1351_s17 = smov 4  }
  0x2c   : > { %1102 = dma.hbm_to_vmem [thread:$0]  (!%p1455_p12), %s1635_s3, 1024, %s224_s15, [#allocation4], %s1350_s14, %s1350_s14, %s1351_s17  }
  0x2d   : > { %s1248_s23 = scalar_lea.hbm %s1637_s5, 1024 }
  0x2e   : > { %p1249_p13 = scmp.ne.s32.totalorder %s1637_s5, %s1248_s23  ;;  %p1255_p9 = scmp.lt.u32.totalorder %s1248_s23, %s1637_s5 }
  0x30   : > { %p1251_p5 = pnand %p1249_p13, %p1222_p0 }
  0x32   : > { %p1252_p6 = pneg %p1251_p5 }
  0x34   : > { %p1257_p10 = pnand %p1255_p9, %p1252_p6 }
  0x36   : > { %1260 = shalt.err (!%p1257_p10)
}
  0x37   : > { %s1261_s15 = scalar_lea.vmem %s1459_s18, 1024  ;;  %p1269_p4 = scmp.lt.s32.totalorder %s1459_s18, %s1459_s18 }
  0x38   : > { %p1262_p1 = scmp.ne.s32.totalorder %s1459_s18, %s1261_s15  ;;  %p1270_p7 = scmp.lt.s32.totalorder %s1261_s15, %s1261_s15 }
  0x3a   : > { %p1264_p2 = pnand %p1262_p1, %p1222_p0  ;;  %p1271_p8 = por %p1270_p7, %p1269_p4 }
  0x3c   : > { %p1265_p3 = pneg %p1264_p2 }
  0x3e   : > { %p1272_p11 = pnand %p1271_p8, %p1265_p3 }
  0x40   : > { %1275 = shalt.err (!%p1272_p11)
}
  0x41   : > { %1105 = dma.hbm_to_vmem [thread:$0]  (!%p1455_p12), %s1637_s5, 1024, %s1459_s18, [#allocation7], %s1350_s14, %s1350_s14, %s1351_s17  }
  0x42   : > { %p1648_p13 = scmp.ne.s32.totalorder %s1646_s13, 0 }
  0x43   : > { %p1649_p5 = scmp.eq.s32.totalorder (!%p1648_p13), %s1419_s28, 0 }
  0x44   : > { %268 = sbr.rel (%p1648_p13) target bundleno = 1027 (0x403), region = 48 }
  0x4b   : > { %1321 = dma.done.wait (%p1649_p5), [#allocation4], 1024   ;;  %p1650_p0 = pmov %p1649_p5 }
  0x4d   : > { %1323 = vsyncadd (%p1650_p0), [#allocation4], 4294966272  ;;  %p1651_p6 = pmov %p1650_p0 }
  0x4e   : > { %p1652_p9 = pmov %p1650_p0 }
  0x4f   : > { %1325 = dma.done.wait (%p1651_p6), [#allocation7], 1024  }
  0x50   : > { %1327 = vsyncadd (%p1652_p9), [#allocation7], 4294966272  ;;  %s944_s16 = sshll.u32 %s1419_s28, 1  ;;  %v1352_v0 = vmov 0.0   ;;  %vm316_vm0 = vcmask 64512   ;;  %v1196_v10 = vld [vmem:[%s1633_s1] sm:$0xff]  }
  0x51   : > { %p306_p10 = scmp.lt.s32.totalorder %s944_s16, 3  ;;  %330 = vst [vmem:[#allocation2 + $0x29] sm:$0x1] %v1352_v0  ;;  %319 = vst [vmem:[#allocation2] sm:$0x1] %v1352_v0  ;;  %v1197_v12 = vld [vmem:[%s1633_s1 + $0x8] sm:$0xff]   ;;  %1029 = vmatprep.subr.bf16.mxu0 %v1196_v10 }
  0x52   : > { %320 = vst [vmem:[#allocation2 + $0x11] sm:$0x1] %v1352_v0  ;;  %329 = vst [vmem:[#allocation2 + $0x18] sm:$0x1] %v1352_v0  ;;  %s1353_s29 = smov 8   ;;  %1030 = vmatpush3.bf16.msra.mxu0 %v1196_v10  ;;  %v1198_v13 = vld [vmem:[%s1633_s1 + $0x10] sm:$0xff]  }
  0x53   : > { %518 = vst [vmem:[#allocation2 + $0x12] sm:$0x3] %v1352_v0  ;;  %522 = vst [vmem:[#allocation2 + $0x2a] sm:$0x3] %v1352_v0  ;;  %s1661_s16 = smov (!%p306_p10, %s944_s16), 3  ;;  %1031 = vmatprep.subr.bf16.mxu0 %v1197_v12  ;;  %v1199_v20 = vld [vmem:[%s1633_s1 + $0x18] sm:$0xff]  }
  0x54   : > { %s996_s13 = sshll.u32 %s1661_s16, 4  ;;  %s1354_s19 = smov 16   ;;  %v1200_v23 = vld [vmem:[%s1633_s1 + $0x20] sm:$0xff]   ;;  %v1201_v24 = vld [vmem:[%s1633_s1 + $0x28] sm:$0xff]   ;;  %v1202_v25 = vld [vmem:[%s1633_s1 + $0x30] sm:$0xff]   ;;  %vm357_vm1 = vcmask 130048  }
  0x55   : > { %s310_s17 = scalar_lea.vmem %s1632_s0, %s996_s13  ;;  %v1203_v26 = vld [vmem:[%s1633_s1 + $0x38] sm:$0xff]   ;;  %vm360_vm2 = vcmask 195584   ;;  %v1204_v51 = vld [vmem:[#allocation3] sm:$0xff]   ;;  %v1206_v53 = vld [vmem:[#allocation3 + $0x10] sm:$0xff]   ;;  %s1355_s9 = smov 32   ;;  %vm549_vm4 = vcmask 261120  }
  0x56   : > { %v947_v1 = vld [vmem:[%s310_s17 + $0x10] sm:$0xff]  ;;  %v948_v2 = vld [vmem:[%s310_s17 + $0x18] sm:$0xff]  ;;  %v314_v3 = vld [vmem:[%s310_s17] sm:$0xff]  ;;  %1032 = vmatpush3.bf16.msra.mxu0 %v1197_v12  ;;  %1049 = vmatprep.subr.bf16.mxu1 %v1204_v51  ;;  %vm552_vm5 = vcmask 392192   ;;  %s998_s20 = sshll.u32 %s1419_s28, 9  ;;  %p1653_p1 = scmp.ne.s32.totalorder %s1644_s11, 0 }
  0x57   : > { %v326_v4 = vsel %vm316_vm0, %v947_v1, 0.0  ;;  %v327_v5 = vsel %vm316_vm0, %v948_v2, 0.0  ;;  %v315_v6 = vld [vmem:[%s310_s17 + $0x8] sm:$0xff]  ;;  %v317_v7 = vsel %vm316_vm0, %v314_v3, 0.0  ;;  %1033 = vmatprep.subr.bf16.mxu0 %v1198_v13  ;;  %vm958_vm3 = vmpackc.low %vm360_vm2, %vm360_vm2  ;;  %v1205_v52 = vld [vmem:[#allocation3 + $0x8] sm:$0xff]   ;;  %1050 = vmatpush3.bf16.msra.mxu1 %v1204_v51  ;;  %s1588_s23 = scalar_lea.hbm %s1639_s7, %s998_s20 }
  0x58   : > { %331 = vst [vmem:[#allocation2 + $0x19] sm:$0xff] %v326_v4  ;;  %332 = vst [vmem:[#allocation2 + $0x21] sm:$0xff] %v327_v5  ;;  %v1166_v8 = vpack.i.bf16 %v327_v5, %v326_v4  ;;  %v318_v9 = vsel %vm316_vm0, %v315_v6, 0.0  ;;  %1051 = vmatprep.subr.bf16.mxu1 %v1205_v52  ;;  %v1207_v54 = vld [vmem:[#allocation3 + $0x18] sm:$0xff]   ;;  %v1208_v55 = vld [vmem:[#allocation3 + $0x20] sm:$0xff]  }
  0x59   : > { %321 = vst [vmem:[#allocation2 + $0x1] sm:$0xff] %v317_v7  ;;  %322 = vst [vmem:[#allocation2 + $0x9] sm:$0xff] %v318_v9  ;;  %v1156_v11 = vpack.i.bf16 %v318_v9, %v317_v7  ;;  %v1209_v56 = vld [vmem:[#allocation3 + $0x28] sm:$0xff]   ;;  %v949_v57 = vld [vmem:[%s1634_s2] ss:$0 sm:$0xff] }
  0x5a   : > { %1167 = vrot.lane.b32.xlu1 %v1166_v8, %s1353_s29  ;;  %1034 = vmatpush3.bf16.msra.mxu0 %v1198_v13  ;;  %v1210_v4 = vld [vmem:[#allocation3 + $0x30] sm:$0xff]   ;;  %v1211_v9 = vld [vmem:[#allocation3 + $0x38] sm:$0xff]   ;;  %v1212_v13 = vld [vmem:[#allocation6] sm:$0xff]  }
  0x5b   : > { %1157 = vrot.lane.b32.xlu0 %v1156_v11, %s1353_s29  ;;  %1035 = vmatprep.subr.bf16.mxu0 %v1199_v20  ;;  %vm973_vm6 = vmpackc.low %vm552_vm5, %vm552_vm5 }
  0x5c   : > { %1052 = vmatpush3.bf16.msra.mxu1 %v1205_v52 }
  0x5d   : > { %1053 = vmatprep.subr.bf16.mxu1 %v1206_v53 }
  0x5e   : > { %1036 = vmatpush3.bf16.msra.mxu0 %v1199_v20  ;;  %v1216_v20 = vld [vmem:[#allocation6 + $0x20] sm:$0xff]  }
  0x5f   : > { %v367_v14 = vld [vmem:[#allocation2 + $0x1a] sm:$0xff]  ;;  %v368_v15 = vld [vmem:[#allocation2 + $0x22] sm:$0xff]  ;;  %1037 = vmatprep.subr.bf16.mxu0 %v1200_v23 }
  0x60   : > { %v363_v16 = vld [vmem:[#allocation2 + $0x18] sm:$0xff]  ;;  %v1171_v17 = vpack.i.bf16 %v368_v15, %v367_v14  ;;  %v337_v18 = vld [vmem:[#allocation2 + $0x2] sm:$0xff]  ;;  %v338_v19 = vld [vmem:[#allocation2 + $0xa] sm:$0xff]  ;;  %1054 = vmatpush3.bf16.msra.mxu1 %v1206_v53 }
  0x61   : > { %521 = vst [vmem:[#allocation2 + $0x18] sm:$0x3] %v1352_v0  ;;  %v1161_v21 = vpack.i.bf16 %v338_v19, %v337_v18  ;;  %v333_v22 = vld [vmem:[#allocation2] sm:$0xff]  ;;  %v334_v35 = vld [vmem:[#allocation2 + $0x8] sm:$0xff]  ;;  %1055 = vmatprep.subr.bf16.mxu1 %v1207_v54  ;;  %v1213_v14 = vld [vmem:[#allocation6 + $0x8] sm:$0xff]  }
  0x62   : > { %1172 = vrot.lane.b32.xlu1 %v1171_v17, %s1354_s19  ;;  %517 = vst [vmem:[#allocation2] sm:$0x3] %v1352_v0  ;;  %1038 = vmatpush3.bf16.msra.mxu0 %v1200_v23  ;;  %v364_v31 = vld [vmem:[#allocation2 + $0x20] sm:$0xff]  ;;  %v1215_v19 = vld [vmem:[#allocation6 + $0x18] sm:$0xff]  }
  0x63   : > { %1162 = vrot.lane.b32.xlu0 %v1161_v21, %s1354_s19  ;;  %1039 = vmatprep.subr.bf16.mxu0 %v1201_v24  ;;  %v1214_v18 = vld [vmem:[#allocation6 + $0x10] sm:$0xff]   ;;  %v1217_v21 = vld [vmem:[#allocation6 + $0x28] sm:$0xff]  }
  0x64   : > { %1056 = vmatpush3.bf16.msra.mxu1 %v1207_v54 }
  0x65   : > { %1057 = vmatprep.subr.bf16.mxu1 %v1208_v55 }
  0x66   : > { %1040 = vmatpush3.bf16.msra.mxu0 %v1201_v24 }
  0x67   : > { %1041 = vmatprep.subr.bf16.mxu0 %v1202_v25 }
  0x68   : > { %1058 = vmatpush3.bf16.msra.mxu1 %v1208_v55 }
  0x69   : > { %1059 = vmatprep.subr.bf16.mxu1 %v1209_v56 }
  0x6a   : > { %1042 = vmatpush3.bf16.msra.mxu0 %v1202_v25 }
  0x6b   : > { %1043 = vmatprep.subr.bf16.mxu0 %v1203_v26 }
  0x6c   : > { %1060 = vmatpush3.bf16.msra.mxu1 %v1209_v56 }
  0x6d   : > { %1061 = vmatprep.subr.bf16.mxu1 %v1210_v4 }
  0x6e   : > { %1044 = vmatpush3.bf16.msra.mxu0 %v1203_v26 }
  0x6f   : > { %1069 = vmatprep.subr.bf16.mxu0 %v1212_v13 }
  0x70   : > { %1062 = vmatpush3.bf16.msra.mxu1 %v1210_v4 }
  0x71   : > { %1063 = vmatprep.subr.bf16.mxu1 %v1211_v9 }
  0x74   : > { %1064 = vmatpush3.bf16.msra.mxu1 %v1211_v9 }
  0xcc   : > { %v1168_v27 = vpop.permute.xlu1 %1167 }
  0xcd   : > { %v1158_v28 = vpop.permute.xlu0 %1157  ;;  %v1170_v29 = vunpack.i.h.bf16 %v1168_v27  ;;  %v1169_v30 = vunpack.i.l.bf16 %v1168_v27 }
  0xce   : > { %v1160_v32 = vunpack.i.h.bf16 %v1158_v28  ;;  %v1159_v33 = vunpack.i.l.bf16 %v1158_v28 }
  0xcf   : > { %v385_v39 = vsel %vm316_vm0, %v363_v16, %v1169_v30  ;;  %v386_v40 = vsel %vm316_vm0, %v364_v31, %v1170_v29 }
  0xd0   : > { %v355_v45 = vsel %vm316_vm0, %v333_v22, %v1159_v33  ;;  %v356_v46 = vsel %vm316_vm0, %v334_v35, %v1160_v32 }
  0xd4   : > { %v1173_v34 = vpop.permute.xlu1 %1172 }
  0xd5   : > { %v1175_v36 = vunpack.i.h.bf16 %v1173_v34  ;;  %v1174_v37 = vunpack.i.l.bf16 %v1173_v34  ;;  %v1163_v38 = vpop.permute.xlu0 %1162 }
  0xd6   : > { %v1165_v41 = vunpack.i.h.bf16 %v1163_v38  ;;  %v1164_v42 = vunpack.i.l.bf16 %v1163_v38 }
  0xd7   : > { %v387_v43 = vsel %vm357_vm1, %v385_v39, %v1174_v37  ;;  %v388_v44 = vsel %vm357_vm1, %v386_v40, %v1175_v36 }
  0xd8   : > { %v962_v47 = vpack.c.bf16 %v388_v44, %v387_v43  ;;  %v358_v48 = vsel %vm357_vm1, %v355_v45, %v1164_v42  ;;  %v359_v49 = vsel %vm357_vm1, %v356_v46, %v1165_v41 }
  0xd9   : > { %v959_v50 = vpack.c.bf16 %v359_v49, %v358_v48  ;;  %v1218_v48 = vld [vmem:[#allocation6 + $0x30] sm:$0xff]   ;;  %v1219_v49 = vld [vmem:[#allocation6 + $0x38] sm:$0xff]  }
  0xdb   : > { %1045 = vmatprep.mubr.msk.bf16.mxu0 %vm958_vm3, %v959_v50  ;;  %v964_v50 = vld [vmem:[%s1636_s4] ss:$0 sm:$0xff] }
  0xdc   : > { %1046 = vmatmul.mubr.msk.bf16.vlgmr.msra.gmra.mrb[0].mxu0 %vm958_vm3, %v962_v47 }
  0xdd   : > { %1070 = vmatpush3.bf16.msra.mxu0 %v1212_v13 }
  0xde   : > { %1071 = vmatprep.subr.bf16.mxu0 %v1213_v14 }
  0xe1   : > { %1072 = vmatpush3.bf16.msra.mxu0 %v1213_v14 }
  0xe2   : > { %1073 = vmatprep.subr.bf16.mxu0 %v1214_v18 }
  0xe5   : > { %1074 = vmatpush3.bf16.msra.mxu0 %v1214_v18 }
  0xe6   : > { %1075 = vmatprep.subr.bf16.mxu0 %v1215_v19 }
  0xe9   : > { %1076 = vmatpush3.bf16.msra.mxu0 %v1215_v19 }
  0xea   : > { %1077 = vmatprep.subr.bf16.mxu0 %v1216_v20 }
  0xed   : > { %1078 = vmatpush3.bf16.msra.mxu0 %v1216_v20 }
  0xee   : > { %1079 = vmatprep.subr.bf16.mxu0 %v1217_v21 }
  0xf1   : > { %1080 = vmatpush3.bf16.msra.mxu0 %v1217_v21 }
  0xf2   : > { %1081 = vmatprep.subr.bf16.mxu0 %v1218_v48 }
  0xf5   : > { %1082 = vmatpush3.bf16.msra.mxu0 %v1218_v48 }
  0xf6   : > { %1083 = vmatprep.subr.bf16.mxu0 %v1219_v49 }
  0xf9   : > { %1084 = vmatpush3.bf16.msra.mxu0 %v1219_v49 }
 0x1af   : > { %v1047_v58 = vpop.f32.mrb[0].mxu0 }
 0x1b0   : > { %v507_v59 = vadd.f32 %v1047_v58, %v949_v57  ;;  %v498_v60 = vpop.f32.mrb[1].mxu0 }
 0x1b1   : > { %v499_v61 = vadd.f32 %v949_v57, %v498_v60  ;;  %v1048_v62 = vpop.f32.mrb[2].mxu0 }
 0x1b2   : > { %v515_v63 = vmax.f32 %v507_v59, 0.0  ;;  %v510_v0 = vadd.f32 %v1048_v62, %v949_v57  ;;  %v501_v1 = vpop.f32.mrb[3].mxu0 }
 0x1b3   : > { %v513_v2 = vmax.f32 %v499_v61, 0.0  ;;  %v502_v3 = vadd.f32 %v949_v57, %v501_v1  ;;  %v979_v1 = vld [vmem:[%s1638_s6] ss:$0 sm:$0xff] }
 0x1b4   : > { %523 = vst [vmem:[#allocation2 + $0x1a] sm:$0xff] %v515_v63  ;;  %v516_v5 = vmax.f32 %v510_v0, 0.0 }
 0x1b5   : > { %519 = vst [vmem:[#allocation2 + $0x2] sm:$0xff] %v513_v2  ;;  %v514_v6 = vmax.f32 %v502_v3, 0.0 }
 0x1b6   : > { %524 = vst [vmem:[#allocation2 + $0x22] sm:$0xff] %v516_v5  ;;  %v1186_v7 = vpack.i.bf16 %v516_v5, %v515_v63 }
 0x1b7   : > { %520 = vst [vmem:[#allocation2 + $0xa] sm:$0xff] %v514_v6  ;;  %v1176_v8 = vpack.i.bf16 %v514_v6, %v513_v2 }
 0x1b9   : > { %1177 = vrot.lane.b32.xlu0 %v1176_v8, %s1354_s19 }
 0x1bb   : > { %v555_v41 = vld [vmem:[#allocation2 + $0x18] sm:$0xff] }
 0x1bc   : > { %v525_v29 = vld [vmem:[#allocation2] sm:$0xff] }
 0x1bd   : > { %1187 = vrot.lane.b32.xlu0 %v1186_v7, %s1354_s19  ;;  %v559_v15 = vld [vmem:[#allocation2 + $0x1c] sm:$0xff]  ;;  %v560_v16 = vld [vmem:[#allocation2 + $0x24] sm:$0xff]  ;;  %s302_s19 = sand.u32 1, %s1338_s25  }
 0x1be   : > { %v529_v10 = vld [vmem:[#allocation2 + $0x4] sm:$0xff]  ;;  %v530_v11 = vld [vmem:[#allocation2 + $0xc] sm:$0xff]  ;;  %v1191_v17 = vpack.i.bf16 %v560_v16, %v559_v15  ;;  %s943_s16 = sshll.u32 %s302_s19, 5  ;;  %s1590_s28 = scalar_lea.sflag [#allocation5], %s302_s19 }
 0x1bf   : > { %v1181_v12 = vpack.i.bf16 %v530_v11, %v529_v10  ;;  %v526_v30 = vld [vmem:[#allocation2 + $0x8] sm:$0xff]  ;;  %v556_v42 = vld [vmem:[#allocation2 + $0x20] sm:$0xff]  ;;  %s304_s14 = scalar_lea.vmem [#allocation8], %s943_s16 }
 0x1c0   : > { %s851_s17 = sshll.u32 %s304_s14, 4  ;;  %s1583_s17 = int_to_ptr.vmem [resolvable:$true] %s851_s17 }
 0x1c1   : > { %1182 = vrot.lane.b32.xlu1 %v1181_v12, %s1355_s9  ;;  %s1276_s8 = scalar_lea.vmem %s1583_s17, 512 }
 0x1c2   : > { %p1277_p12 = scmp.ne.s32.totalorder %s1583_s17, %s1276_s8 }
 0x1c4   : > { %p1278_p2 = pnand %p1277_p12, %p1653_p1 }
 0x1c5   : > { %1192 = vrot.lane.b32.xlu1 %v1191_v17, %s1355_s9  ;;  %s1356_s9 = smov [#allocation8]  }
 0x1c6   : > { %p1279_p3 = pneg %p1278_p2  ;;  %s1280_s15 = sshll.u32 %s1356_s9, 4  ;;  %s1281_s15 = int_to_ptr.vmem [resolvable:$false] %s1280_s15 }
 0x1c7   : > { %s1282_s10 = scalar_lea.vmem %s1281_s15, 1024  ;;  %p1283_p4 = scmp.lt.s32.totalorder %s1583_s17, %s1281_s15 }
 0x1c8   : > { %p1284_p7 = scmp.lt.s32.totalorder %s1282_s10, %s1276_s8 }
 0x1ca   : > { %p1285_p8 = por %p1284_p7, %p1283_p4 }
 0x1cc   : > { %p1286_p11 = pnand %p1285_p8, %p1279_p3 }
 0x22b   : > { %v1178_v22 = vpop.permute.xlu0 %1177 }
 0x22c   : > { %v1180_v23 = vunpack.i.h.bf16 %v1178_v22  ;;  %v1179_v24 = vunpack.i.l.bf16 %v1178_v22 }
 0x22e   : > { %v547_v33 = vsel %vm357_vm1, %v525_v29, %v1179_v24  ;;  %v548_v34 = vsel %vm357_vm1, %v526_v30, %v1180_v23 }
 0x22f   : > { %v1188_v25 = vpop.permute.xlu0 %1187 }
 0x230   : > { %v1190_v31 = vunpack.i.h.bf16 %v1188_v25  ;;  %v1189_v32 = vunpack.i.l.bf16 %v1188_v25 }
 0x232   : > { %v578_v43 = vsel %vm357_vm1, %v556_v42, %v1190_v31  ;;  %v577_v44 = vsel %vm357_vm1, %v555_v41, %v1189_v32 }
 0x233   : > { %v1183_v26 = vpop.permute.xlu1 %1182 }
 0x234   : > { %v1185_v27 = vunpack.i.h.bf16 %v1183_v26  ;;  %v1184_v28 = vunpack.i.l.bf16 %v1183_v26 }
 0x236   : > { %v550_v35 = vsel %vm549_vm4, %v547_v33, %v1184_v28  ;;  %v551_v36 = vsel %vm549_vm4, %v548_v34, %v1185_v27 }
 0x237   : > { %v1193_v37 = vpop.permute.xlu1 %1192  ;;  %v974_v38 = vpack.c.bf16 %v551_v36, %v550_v35 }
 0x238   : > { %v1195_v39 = vunpack.i.h.bf16 %v1193_v37  ;;  %v1194_v40 = vunpack.i.l.bf16 %v1193_v37 }
 0x239   : > { %1065 = vmatprep.mubr.msk.bf16.mxu1 %vm973_vm6, %v974_v38 }
 0x23a   : > { %v579_v45 = vsel %vm549_vm4, %v577_v44, %v1194_v40  ;;  %v580_v46 = vsel %vm549_vm4, %v578_v43, %v1195_v39 }
 0x23b   : > { %v977_v47 = vpack.c.bf16 %v580_v46, %v579_v45 }
 0x23d   : > { %1066 = vmatmul.mubr.msk.bf16.vlgmr.msra.gmra.mrb[0].mxu1 %vm973_vm6, %v977_v47 }
 0x310   : > { %v1067_v51 = vpop.f32.mrb[0].mxu1 }
 0x311   : > { %v699_v52 = vadd.f32 %v1067_v51, %v964_v50  ;;  %v690_v53 = vpop.f32.mrb[1].mxu1 }
 0x312   : > { %v691_v54 = vadd.f32 %v964_v50, %v690_v53  ;;  %v1068_v55 = vpop.f32.mrb[2].mxu1 }
 0x313   : > { %v702_v56 = vadd.f32 %v1068_v55, %v964_v50  ;;  %v693_v57 = vpop.f32.mrb[3].mxu1  ;;  %v707_v59 = vmax.f32 %v699_v52, 0.0 }
 0x314   : > { %v694_v58 = vadd.f32 %v964_v50, %v693_v57  ;;  %v705_v61 = vmax.f32 %v691_v54, 0.0 }
 0x315   : > { %v708_v60 = vmax.f32 %v702_v56, 0.0 }
 0x316   : > { %v706_v62 = vmax.f32 %v694_v58, 0.0 }
 0x317   : > { %v710_v63 = vpack.c.bf16 %v708_v60, %v707_v59 }
 0x318   : > { %v709_v0 = vpack.c.bf16 %v706_v62, %v705_v61 }
 0x31a   : > { %1085 = vmatprep.mubr.bf16.mxu0 %v709_v0 }
 0x31b   : > { %1086 = vmatmul.mubr.bf16.vlgmr.msra.gmra.mrb[4].mxu0 %v710_v63 }
 0x3ee   : > { %v1087_v2 = vpop.f32.mrb[4].mxu0 }
 0x3ef   : > { %v825_v3 = vadd.f32 %v1087_v2, %v979_v1  ;;  %v816_v4 = vpop.f32.mrb[5].mxu0 }
 0x3f0   : > { %v817_v5 = vadd.f32 %v979_v1, %v816_v4  ;;  %v1088_v6 = vpop.f32.mrb[6].mxu0 }
 0x3f1   : > { %988 = vst [vmem:[%s304_s14 + $0x10] sm:$0xff] %v825_v3  ;;  %v828_v7 = vadd.f32 %v1088_v6, %v979_v1  ;;  %v819_v8 = vpop.f32.mrb[7].mxu0 }
 0x3f2   : > { %831 = vst [vmem:[%s304_s14] sm:$0xff] %v817_v5  ;;  %v820_v9 = vadd.f32 %v979_v1, %v819_v8 }
 0x3f3   : > { %989 = vst [vmem:[%s304_s14 + $0x18] sm:$0xff] %v828_v7 }
 0x3f4   : > { %832 = vst [vmem:[%s304_s14 + $0x8] sm:$0xff] %v820_v9 }
 0x3f5   : > { %1289 = shalt.err (!%p1286_p11)
}
 0x3f6   : > { %s1290_s19 = scalar_lea.hbm %s1588_s23, 512  ;;  %s1294_s18 = scalar_lea.hbm %s1639_s7, 1024 }
 0x3f7   : > { %p1291_p13 = scmp.ne.s32.totalorder %s1588_s23, %s1290_s19  ;;  %p1295_p6 = scmp.lt.u32.totalorder %s1588_s23, %s1639_s7 }
 0x3f8   : > { %p1296_p9 = scmp.lt.u32.totalorder %s1294_s18, %s1290_s19  ;;  %p1298_p12 = scmp.lt.u32.totalorder %s1290_s19, %s1588_s23 }
 0x3f9   : > { %p1292_p5 = pnand %p1291_p13, %p1653_p1 }
 0x3fa   : > { %p1297_p10 = por %p1296_p9, %p1295_p6 }
 0x3fb   : > { %p1293_p0 = pneg %p1292_p5 }
 0x3fc   : > { %p1299_p2 = por %p1298_p12, %p1297_p10 }
 0x3fe   : > { %p1300_p3 = pnand %p1299_p2, %p1293_p0 }
 0x400   : > { %1303 = shalt.err (!%p1300_p3)
}
 0x401   : > { %s1357_s21 = smov 128  }
 0x402   : > { %1097 = dma.vmem_to_hbm [thread:$0]  (%p1653_p1), %s1583_s17, 512, %s1588_s23, %s1590_s28, %s1357_s21, %s1357_s21, %s1353_s29  }
 0x403 PF: > { %p1114_p4 = scmp.ge.s32.totalorder %s1346_s27, 2  ;;  %s866_s22 = sand.u32 1, %s1334_s24  }
 0x404   : > { %p1654_p7 = scmp.ne.s32.totalorder %s1645_s12, 0  ;;  %s867_s8 = scalar_lea.sflag [#allocation5], %s866_s22 }
 0x406   : > { %p1107_p8 = pnand %p1114_p4, %p1654_p7 }
 0x408   : > { %1329 = dma.done.wait (!%p1107_p8), %s867_s8, 512  }
 0x409   : > { %1331 = vsyncadd (!%p1107_p8), %s867_s8, 4294966784  ;;  %s1655_s11 = sld [smem:[#allocation12_spill]]  ;;  %p19_p11 = scmp.ge.s32.totalorder %s1423_s30, 4  }
 0x40a   : > { %s1656_s24 = smov %s1338_s25  ;;  %s1657_s25 = smov %s1342_s26 }
 0x40b   : > { %s1659_s27 = smov %s1423_s30  ;;  %21 = sbr.rel (!%p19_p11) target bundleno = 5 (0x5), region = 95 }
 0x40f   : > { %s1658_s26 = smov %s1655_s11 }
 0x412   :  { %872 = vsyncpa [#allocation4], 1 }
 0x413   :  { %874 = vsyncpa [#allocation4 + $0x1], 1 }
 0x414   :  { %875 = vsyncpa [#allocation7], 1 }
 0x415   :  { %876 = vsyncpa [#allocation5], 1 }
 0x416   :  { %878 = vsyncpa [#allocation5 + $0x1], 1 }

</bundles_post_ra>
